<compile_context>
chip_gen: v7x
topology: tpu7x:2x2x1
jax: 0.10.0
libtpu: 0.0.40
codegen_flags: <defaults>
</compile_context>

<pallas_src>
import math

import jax
import jax.numpy as jnp
from jax.experimental import pallas as pl
from jax.experimental.pallas import tpu as pltpu

LANE = 128
_VMEM_LIMIT_CACHE = None


def _round_up(x, m):
    return (x + m - 1) // m * m


def _pad_to(arr, shape):
    pads = [(0, t - s) for s, t in zip(arr.shape, shape)]
    if any(hi for _, hi in pads):
        return jnp.pad(arr, pads)
    return arr


def _vmem_limit_bytes():
    """Scoped-VMEM limit: half of physical VMEM, capped at 64 MiB.
    -> 32 MiB on v7x (64 MiB/TC), 64 MiB on v5e/v6e (128 MiB)."""
    global _VMEM_LIMIT_CACHE
    if _VMEM_LIMIT_CACHE is None:
        cap = None
        try:
            cap = getattr(pltpu.get_tpu_info(), "vmem_capacity_bytes", None)
        except Exception:
            cap = None
        if not cap:
            cap = 64 * 1024 * 1024  # conservative (v7x-sized) fallback
        _VMEM_LIMIT_CACHE = min(cap // 2, 64 * 1024 * 1024)
    return _VMEM_LIMIT_CACHE


def _pick_tiles(n_pad, in_f, out_f_pad, adj_bytes, x_bytes, vmem_limit):
    """Pick (tm, tk). n_pad is a multiple of 128, so 128 always divides."""
    # Row tile: modest, and guarantee >=2 row steps when possible so the
    # 'parallel' axis can be sharded across v7x's two TensorCores.
    tm = next(c for c in (512, 256, 128) if n_pad % c == 0)
    if n_pad >= 2 * LANE:
        tm = min(tm, n_pad // 2)
    # k tile (adj stream): as large as the VMEM budget allows.
    fixed = (2 * (in_f * out_f_pad * 4 + out_f_pad * 4)      # resident w, bias
             + 2 * tm * out_f_pad * 4                         # output buffers
             + tm * out_f_pad * 4)                            # f32 accumulator
    tk = 128
    for c in (2048, 1024, 512, 256, 128):
        if n_pad % c != 0:
            continue
        per_step = 2 * (tm * c * adj_bytes + c * in_f * x_bytes)  # double-buffered
        if fixed + per_step <= int(vmem_limit * 0.75):
            tk = c
            break
    return tm, tk


# --------------------------------------------------------------------------
# Fused kernel: out[i, :] = sum_k adj[i, k-tile] @ (x[k-tile] @ w) (+ bias)
# grid = (row tiles [parallel], k tiles [arbitrary, last]); f32 accumulator.
# --------------------------------------------------------------------------
def _gcn_kernel_bias(adj_ref, x_ref, w_ref, b_ref, o_ref, acc_ref):
    k = pl.program_id(1)

    @pl.when(k == 0)
    def _():
        acc_ref[...] = jnp.zeros_like(acc_ref)

    support = jnp.dot(x_ref[...], w_ref[...], preferred_element_type=jnp.float32)
    a = adj_ref[...]
    acc_ref[...] += jnp.dot(a, support.astype(a.dtype),
                            preferred_element_type=jnp.float32)

    @pl.when(k == pl.num_programs(1) - 1)
    def _():
        o_ref[...] = (acc_ref[...] + b_ref[...]).astype(o_ref.dtype)


def _gcn_kernel_nobias(adj_ref, x_ref, w_ref, o_ref, acc_ref):
    k = pl.program_id(1)

    @pl.when(k == 0)
    def _():
        acc_ref[...] = jnp.zeros_like(acc_ref)

    support = jnp.dot(x_ref[...], w_ref[...], preferred_element_type=jnp.float32)
    a = adj_ref[...]
    acc_ref[...] += jnp.dot(a, support.astype(a.dtype),
                            preferred_element_type=jnp.float32)

    @pl.when(k == pl.num_programs(1) - 1)
    def _():
        o_ref[...] = acc_ref[...].astype(o_ref.dtype)


def _gcn_fused(x, adj, w_pad, b_pad, out_f):
    n, in_f = x.shape
    assert adj.shape == (n, n), "adj must be [N, N]"
    out_f_pad = w_pad.shape[1]

    # Pad the node dimension to a multiple of 128 (zero rows/cols contribute
    # nothing; padded output rows are sliced off below).
    n_pad = _round_up(n, LANE)
    x_p = _pad_to(x, (n_pad, in_f))
    adj_p = _pad_to(adj, (n_pad, n_pad))

    vmem_limit = _vmem_limit_bytes()
    tm, tk = _pick_tiles(n_pad, in_f, out_f_pad,
                         adj_p.dtype.itemsize, x_p.dtype.itemsize, vmem_limit)

    in_specs = [
        pl.BlockSpec((tm, tk), lambda i, k: (i, k),
                     memory_space=pltpu.MemorySpace.VMEM),            # adj stream
        pl.BlockSpec((tk, in_f), lambda i, k: (k, 0),
                     memory_space=pltpu.MemorySpace.VMEM),            # x stream
        pl.BlockSpec((in_f, out_f_pad), lambda i, k: (0, 0),
                     memory_space=pltpu.MemorySpace.VMEM),            # resident weight
    ]
    args = [adj_p, x_p, w_pad]
    if b_pad is not None:
        in_specs.append(pl.BlockSpec((1, out_f_pad), lambda i, k: (0, 0),
                                     memory_space=pltpu.MemorySpace.VMEM))
        args.append(b_pad)
        kernel = _gcn_kernel_bias
    else:
        kernel = _gcn_kernel_nobias

    out_pad = pl.pallas_call(
        kernel,
        out_shape=jax.ShapeDtypeStruct((n_pad, out_f_pad), x.dtype),
        grid_spec=pltpu.PrefetchScalarGridSpec(
            num_scalar_prefetch=0,
            grid=(n_pad // tm, n_pad // tk),
            in_specs=in_specs,
            out_specs=pl.BlockSpec((tm, out_f_pad), lambda i, k: (i, 0),
                                   memory_space=pltpu.MemorySpace.VMEM),
            scratch_shapes=[pltpu.VMEM((tm, out_f_pad), jnp.float32)],
        ),
        compiler_params=pltpu.CompilerParams(
            dimension_semantics=("parallel", "arbitrary"),
            vmem_limit_bytes=vmem_limit,
        ),
    )(*args)

    return out_pad[:n, :out_f]


# --------------------------------------------------------------------------
# Public API: parameter prep hoisted out of the per-forward path.
# --------------------------------------------------------------------------
def make_gcn_forward(weight, bias=None):
    """Build a jitted GCN forward.  weight: [in_f, out_f], bias: [out_f] | None.
    forward(x, adj): x [N, in_f], adj [N, N] (dense; pass bf16 adj upstream for
    genuine bf16 streaming of the O(N^2) operand - no wrapper cast is done)."""
    in_f, out_f = weight.shape
    out_f_pad = _round_up(out_f, LANE)
    w_pad = jnp.zeros((in_f, out_f_pad), jnp.float32)
    w_pad = w_pad.at[:, :out_f].set(weight.astype(jnp.float32))
    if bias is not None:
        b_pad = jnp.zeros((1, out_f_pad), jnp.float32)
        b_pad = b_pad.at[0, :out_f].set(bias.astype(jnp.float32))
    else:
        b_pad = None

    @jax.jit
    def forward(x, adj):
        return _gcn_fused(x, adj, w_pad, b_pad, out_f)

    return forward


if __name__ == "__main__":
    # Small shapes consistent with the GCN layer.
    N = 64            # number of graph nodes
    IN_FEATURES = 32
    OUT_FEATURES = 16

    key = jax.random.PRNGKey(0)
    k_x, k_adj, k_w, k_b = jax.random.split(key, 4)

    # Deterministic init mirroring reset_parameters():
    # uniform(-stdv, stdv) with stdv = 1/sqrt(out_features).
    stdv = 1.0 / math.sqrt(OUT_FEATURES)
    weight = jax.random.uniform(
        k_w, (IN_FEATURES, OUT_FEATURES), jnp.float32, minval=-stdv, maxval=stdv
    )
    bias = jax.random.uniform(
        k_b, (OUT_FEATURES,), jnp.float32, minval=-stdv, maxval=stdv
    )

    # Example inputs: node features and a dense row-normalized adjacency.
    x = jax.random.normal(k_x, (N, IN_FEATURES), jnp.float32)
    adj_raw = jax.random.uniform(k_adj, (N, N), jnp.float32)
    adj = (adj_raw > 0.8).astype(jnp.float32) + jnp.eye(N, dtype=jnp.float32)
    adj = adj / jnp.sum(adj, axis=1, keepdims=True)

    gcn_forward = make_gcn_forward(weight, bias)
    out = gcn_forward(x, adj)
    out = jax.block_until_ready(out)

    # Reference check in plain JAX (f32 path -> tight tolerance).
    ref = adj @ (x @ weight) + bias
    assert out.shape == (N, OUT_FEATURES)
    assert jnp.allclose(out, ref, atol=1e-4, rtol=1e-4)

    # Also exercise the bias=None path once.
    out_nb = jax.block_until_ready(make_gcn_forward(weight, None)(x, adj))
    assert jnp.allclose(out_nb, adj @ (x @ weight), atol=1e-4, rtol=1e-4)

    print("KERNEL_OK")
</pallas_src>

<mosaic_0001>
module attributes {stable_mosaic.version = 11 : i64} {
  func.func @_gcn_kernel_bias(%arg0: i32, %arg1: i32, %arg2: memref<128x128xf32, #tpu.memory_space<vmem>>, %arg3: memref<128x32xf32, #tpu.memory_space<vmem>>, %arg4: memref<32x128xf32, #tpu.memory_space<vmem>>, %arg5: memref<1x128xf32, #tpu.memory_space<vmem>>, %arg6: memref<128x128xf32, #tpu.memory_space<vmem>>, %arg7: memref<128x128xf32, #tpu.memory_space<vmem>>) attributes {dimension_semantics = [#tpu.dimension_semantics<parallel>, #tpu.dimension_semantics<arbitrary>], iteration_bounds = array<i64: 1, 1>, scalar_prefetch = 0 : i64, scratch_operands = 1 : i64, tpu.core_type = #tpu.core_type<tc>, window_params = [{transform_indices = @transform_0, window_bounds = array<i64: 128, 128>}, {transform_indices = @transform_1, window_bounds = array<i64: 128, 32>}, {pipeline_mode = #tpu.pipeline_mode<synchronous>, transform_indices = @transform_2, window_bounds = array<i64: 32, 128>}, {pipeline_mode = #tpu.pipeline_mode<synchronous>, transform_indices = @transform_3, window_bounds = array<i64: 1, 128>}, {transform_indices = @transform_4, window_bounds = array<i64: 128, 128>}]} {
    %c0_i32 = arith.constant 0 : i32
    %0 = arith.cmpi eq, %arg1, %c0_i32 : i32
    %1 = arith.extui %0 : i1 to i32
    %c0_i32_0 = arith.constant 0 : i32
    %2 = arith.cmpi ne, %1, %c0_i32_0 : i32
    scf.if %2 {
      %cst_13 = arith.constant 0.000000e+00 : f32
      %14 = vector.broadcast %cst_13 : f32 to vector<128x128xf32>
      %c0_14 = arith.constant 0 : index
      %c0_15 = arith.constant 0 : index
      %15 = vector.load %arg7[%c0_14, %c0_15] : memref<128x128xf32, #tpu.memory_space<vmem>>, vector<128x128xf32>
      tpu.vector_store %arg7[%c0_14, %c0_15], %14 {strides = array<i32>} : memref<128x128xf32, #tpu.memory_space<vmem>>, vector<128x128xf32>,
    } else {
    }
    %c0 = arith.constant 0 : index
    %c0_1 = arith.constant 0 : index
    %3 = vector.load %arg3[%c0, %c0_1] : memref<128x32xf32, #tpu.memory_space<vmem>>, vector<128x32xf32>
    %c0_2 = arith.constant 0 : index
    %c0_3 = arith.constant 0 : index
    %4 = vector.load %arg4[%c0_2, %c0_3] : memref<32x128xf32, #tpu.memory_space<vmem>>, vector<32x128xf32>
    %cst = arith.constant dense<0.000000e+00> : vector<128x128xf32>
    %5 = tpu.matmul %3, %4, %cst {dimension_numbers = #tpu.dot_dimension_numbers<[1], [0], [0], [1], [0, 0, 1, 1], [], []>} : vector<128x32xf32>, vector<32x128xf32>, vector<128x128xf32> -> vector<128x128xf32>
    %c0_4 = arith.constant 0 : index
    %c0_5 = arith.constant 0 : index
    %6 = vector.load %arg2[%c0_4, %c0_5] : memref<128x128xf32, #tpu.memory_space<vmem>>, vector<128x128xf32>
    %c0_6 = arith.constant 0 : index
    %c0_7 = arith.constant 0 : index
    %7 = vector.load %arg7[%c0_6, %c0_7] : memref<128x128xf32, #tpu.memory_space<vmem>>, vector<128x128xf32>
    %cst_8 = arith.constant dense<0.000000e+00> : vector<128x128xf32>
    %8 = tpu.matmul %6, %5, %cst_8 {dimension_numbers = #tpu.dot_dimension_numbers<[1], [0], [0], [1], [0, 0, 1, 1], [], []>} : vector<128x128xf32>, vector<128x128xf32>, vector<128x128xf32> -> vector<128x128xf32>
    %9 = arith.addf %7, %8 : vector<128x128xf32>
    %c0_9 = arith.constant 0 : index
    %c0_10 = arith.constant 0 : index
    %10 = vector.load %arg7[%c0_9, %c0_10] : memref<128x128xf32, #tpu.memory_space<vmem>>, vector<128x128xf32>
    tpu.vector_store %arg7[%c0_9, %c0_10], %9 {strides = array<i32>} : memref<128x128xf32, #tpu.memory_space<vmem>>, vector<128x128xf32>,
    %c0_i32_11 = arith.constant 0 : i32
    %11 = arith.cmpi eq, %arg1, %c0_i32_11 : i32
    %12 = arith.extui %11 : i1 to i32
    %c0_i32_12 = arith.constant 0 : i32
    %13 = arith.cmpi ne, %12, %c0_i32_12 : i32
    scf.if %13 {
      %c0_13 = arith.constant 0 : index
      %c0_14 = arith.constant 0 : index
      %14 = vector.load %arg7[%c0_13, %c0_14] : memref<128x128xf32, #tpu.memory_space<vmem>>, vector<128x128xf32>
      %c0_15 = arith.constant 0 : index
      %c0_16 = arith.constant 0 : index
      %15 = vector.load %arg5[%c0_15, %c0_16] : memref<1x128xf32, #tpu.memory_space<vmem>>, vector<1x128xf32>
      %16 = vector.broadcast %15 : vector<1x128xf32> to vector<128x128xf32>
      %17 = arith.addf %14, %16 : vector<128x128xf32>
      %c0_17 = arith.constant 0 : index
      %c0_18 = arith.constant 0 : index
      %18 = vector.load %arg6[%c0_17, %c0_18] : memref<128x128xf32, #tpu.memory_space<vmem>>, vector<128x128xf32>
      tpu.vector_store %arg6[%c0_17, %c0_18], %17 {strides = array<i32>} : memref<128x128xf32, #tpu.memory_space<vmem>>, vector<128x128xf32>,
    } else {
    }
    return
  }
  func.func @transform_0(%arg0: i32, %arg1: i32) -> (i32, i32) {
    %c0_i32 = arith.constant 0 : i32
    return %arg0, %arg1 : i32, i32
  }
  func.func @transform_1(%arg0: i32, %arg1: i32) -> (i32, i32) {
    %c0_i32 = arith.constant 0 : i32
    %c0_i32_0 = arith.constant 0 : i32
    return %arg1, %c0_i32 : i32, i32
  }
  func.func @transform_2(%arg0: i32, %arg1: i32) -> (i32, i32) {
    %c0_i32 = arith.constant 0 : i32
    %c0_i32_0 = arith.constant 0 : i32
    %c0_i32_1 = arith.constant 0 : i32
    return %c0_i32, %c0_i32_0 : i32, i32
  }
  func.func @transform_3(%arg0: i32, %arg1: i32) -> (i32, i32) {
    %c0_i32 = arith.constant 0 : i32
    %c0_i32_0 = arith.constant 0 : i32
    %c0_i32_1 = arith.constant 0 : i32
    return %c0_i32, %c0_i32_0 : i32, i32
  }
  func.func @transform_4(%arg0: i32, %arg1: i32) -> (i32, i32) {
    %c0_i32 = arith.constant 0 : i32
    %c0_i32_0 = arith.constant 0 : i32
    return %arg0, %c0_i32 : i32, i32
  }
}

</mosaic_0001>

<bundles_post_ra>
// kernel: forward.1
= control target key start
LH: loop header
LB: loop body
LE: loop exit
PB: predicated region body
PF: predicated region fallthrough
CT: control target
= control target key end

     0   :  { %vm57_vm0 = vcmask 261120   ;;  %s935_s2 = inlined_call_operand.vmem [shape: f32[32,128], index: 2, kind: input, shape index: {}]   ;;  %s936_s1 = inlined_call_operand.vmem [shape: f32[128,32], index: 1, kind: input, shape index: {}]   ;;  %s937_s0 = inlined_call_operand.vmem [shape: f32[128,128], index: 0, kind: input, shape index: {}]   ;;  %s938_s3 = inlined_call_operand.vmem [shape: f32[1,128], index: 3, kind: input, shape index: {}]   ;;  %s939_s4 = inlined_call_operand.vmem [shape: f32[128,128], index: 4, kind: output, shape index: {}]  }
   0x1   :  { %v53_v0 = vld [vmem:[%s935_s2] sm:$0xff]  ;;  %v54_v1 = vld [vmem:[%s935_s2 + $0x8] sm:$0xff]  ;;  %v55_v2 = vld [vmem:[%s935_s2 + $0x10] sm:$0xff] }
   0x2   :  { %v679_v3 = vpack.c.bf16 %v54_v1, %v53_v0  ;;  %v56_v4 = vld [vmem:[%s935_s2 + $0x18] sm:$0xff]  ;;  %v37_v5 = vld [vmem:[%s936_s1] sm:$0xff]  ;;  %v38_v7 = vld [vmem:[%s936_s1 + $0x8] sm:$0xff] }
   0x3   :  { %v683_v6 = vpack.c.bf16 %v56_v4, %v55_v2  ;;  %599 = vmatprep.mubr.msk.f32.mxu0 %vm57_vm0, %v37_v5  ;;  %v39_v8 = vld [vmem:[%s936_s1 + $0x10] sm:$0xff]  ;;  %v40_v9 = vld [vmem:[%s936_s1 + $0x18] sm:$0xff]  ;;  %v41_v10 = vld [vmem:[%s936_s1 + $0x20] sm:$0xff] }
   0x4   :  { %680 = vmatprep.subr.bf16.mxu0 %v679_v3  ;;  %v42_v11 = vld [vmem:[%s936_s1 + $0x28] sm:$0xff]  ;;  %v43_v12 = vld [vmem:[%s936_s1 + $0x30] sm:$0xff]  ;;  %v44_v13 = vld [vmem:[%s936_s1 + $0x38] sm:$0xff] }
   0x5   :  { %682 = vmatpush3.bf16.msra.mxu0 %v679_v3  ;;  %v45_v14 = vld [vmem:[%s936_s1 + $0x40] sm:$0xff]  ;;  %v46_v15 = vld [vmem:[%s936_s1 + $0x48] sm:$0xff]  ;;  %v47_v16 = vld [vmem:[%s936_s1 + $0x50] sm:$0xff] }
   0x6   :  { %684 = vmatprep.subr.bf16.mxu0 %v683_v6  ;;  %v48_v17 = vld [vmem:[%s936_s1 + $0x58] sm:$0xff]  ;;  %v49_v18 = vld [vmem:[%s936_s1 + $0x60] sm:$0xff]  ;;  %v50_v19 = vld [vmem:[%s936_s1 + $0x68] sm:$0xff] }
   0x7   :  { %v51_v20 = vld [vmem:[%s936_s1 + $0x70] sm:$0xff]  ;;  %v52_v21 = vld [vmem:[%s936_s1 + $0x78] sm:$0xff]  ;;  %v251_v23 = vld [vmem:[%s937_s0] sm:$0xff] }
   0x8   :  { %v257_v22 = vld [vmem:[%s937_s0 + $0x30] sm:$0xff]  ;;  %v258_v48 = vld [vmem:[%s937_s0 + $0x38] sm:$0xff]  ;;  %v252_v49 = vld [vmem:[%s937_s0 + $0x8] sm:$0xff] }
   0x9   :  { %686 = vmatpush3.bf16.msra.mxu0 %v683_v6  ;;  %664 = vmatprep.mubr.f32.mxu1 %v257_v22  ;;  %v259_v50 = vld [vmem:[%s937_s0 + $0x40] sm:$0xff]  ;;  %v253_v51 = vld [vmem:[%s937_s0 + $0x10] sm:$0xff]  ;;  %v260_v52 = vld [vmem:[%s937_s0 + $0x48] sm:$0xff] }
   0xa   :  { %v254_v53 = vld [vmem:[%s937_s0 + $0x18] sm:$0xff]  ;;  %v261_v54 = vld [vmem:[%s937_s0 + $0x50] sm:$0xff]  ;;  %v255_v55 = vld [vmem:[%s937_s0 + $0x20] sm:$0xff] }
   0xb   :  { %v262_v56 = vld [vmem:[%s937_s0 + $0x58] sm:$0xff]  ;;  %v256_v57 = vld [vmem:[%s937_s0 + $0x28] sm:$0xff]  ;;  %v263_v58 = vld [vmem:[%s937_s0 + $0x60] sm:$0xff] }
   0xc   :  { %600 = vmatmul.mubr.msk.f32.vlgmr.msra.gmra.mrb[0].mxu0 %vm57_vm0, %v38_v7  ;;  %v264_v59 = vld [vmem:[%s937_s0 + $0x68] sm:$0xff]  ;;  %v265_v60 = vld [vmem:[%s937_s0 + $0x70] sm:$0xff]  ;;  %v266_v61 = vld [vmem:[%s937_s0 + $0x78] sm:$0xff] }
   0xd   :  { %602 = vmatprep.mubr.msk.f32.mxu0 %vm57_vm0, %v39_v8  ;;  %v538_v62 = vld [vmem:[%s938_s3] ss:$0 sm:$0xff] }
  0x10   :  { %603 = vmatmul.mubr.msk.f32.gmra.mrb[2].mxu0 %vm57_vm0, %v40_v9 }
  0x11   :  { %605 = vmatprep.mubr.msk.f32.mxu0 %vm57_vm0, %v41_v10 }
  0x14   :  { %606 = vmatmul.mubr.msk.f32.gmra.mrb[4].mxu0 %vm57_vm0, %v42_v11 }
  0x15   :  { %608 = vmatprep.mubr.msk.f32.mxu0 %vm57_vm0, %v43_v12 }
  0x18   :  { %609 = vmatmul.mubr.msk.f32.gmra.mrb[6].mxu0 %vm57_vm0, %v44_v13 }
  0x19   :  { %611 = vmatprep.mubr.msk.f32.mxu0 %vm57_vm0, %v45_v14 }
  0x1c   :  { %612 = vmatmul.mubr.msk.f32.gmra.mrb[8].mxu0 %vm57_vm0, %v46_v15 }
  0x1d   :  { %614 = vmatprep.mubr.msk.f32.mxu0 %vm57_vm0, %v47_v16 }
  0x20   :  { %615 = vmatmul.mubr.msk.f32.gmra.mrb[10].mxu0 %vm57_vm0, %v48_v17 }
  0x21   :  { %617 = vmatprep.mubr.msk.f32.mxu0 %vm57_vm0, %v49_v18 }
  0x24   :  { %618 = vmatmul.mubr.msk.f32.gmra.mrb[12].mxu0 %vm57_vm0, %v50_v19 }
  0x25   :  { %620 = vmatprep.mubr.msk.f32.mxu0 %vm57_vm0, %v51_v20 }
  0x28   :  { %621 = vmatmul.mubr.msk.f32.gmra.mrb[14].mxu0 %vm57_vm0, %v52_v21 }
  0x29   :  { %655 = vmatprep.mubr.f32.mxu0 %v251_v23 }
  0xdf   :  { %v601_v24 = vpop.f32.mrb[0].mxu0 }
  0xe0   :  { %v172_v25 = vpop.f32.mrb[1].mxu0 }
  0xe1   :  { %v687_v26 = vpack.c.bf16 %v601_v24, %v172_v25 }
  0xe3   :  { %v604_v27 = vpop.f32.mrb[2].mxu0  ;;  %688 = vmatprep.subr.bf16.mxu0 %v687_v26  ;;  %719 = vmatprep.subr.bf16.mxu1 %v687_v26 }
  0xe4   :  { %v182_v28 = vpop.f32.mrb[3].mxu0  ;;  %690 = vmatpush3.bf16.msra.mxu0 %v687_v26  ;;  %727 = vmatpush3.bf16.msra.mxu1 %v687_v26 }
  0xe5   :  { %v691_v29 = vpack.c.bf16 %v604_v27, %v182_v28 }
  0xe7   :  { %v607_v30 = vpop.f32.mrb[4].mxu0  ;;  %692 = vmatprep.subr.bf16.mxu0 %v691_v29  ;;  %720 = vmatprep.subr.bf16.mxu1 %v691_v29 }
  0xe8   :  { %v192_v31 = vpop.f32.mrb[5].mxu0  ;;  %694 = vmatpush3.bf16.msra.mxu0 %v691_v29  ;;  %728 = vmatpush3.bf16.msra.mxu1 %v691_v29 }
  0xe9   :  { %v695_v32 = vpack.c.bf16 %v607_v30, %v192_v31 }
  0xeb   :  { %v610_v33 = vpop.f32.mrb[6].mxu0  ;;  %696 = vmatprep.subr.bf16.mxu0 %v695_v32  ;;  %721 = vmatprep.subr.bf16.mxu1 %v695_v32 }
  0xec   :  { %v202_v34 = vpop.f32.mrb[7].mxu0  ;;  %698 = vmatpush3.bf16.msra.mxu0 %v695_v32  ;;  %729 = vmatpush3.bf16.msra.mxu1 %v695_v32 }
  0xed   :  { %v699_v35 = vpack.c.bf16 %v610_v33, %v202_v34 }
  0xef   :  { %v613_v36 = vpop.f32.mrb[8].mxu0  ;;  %700 = vmatprep.subr.bf16.mxu0 %v699_v35  ;;  %722 = vmatprep.subr.bf16.mxu1 %v699_v35 }
  0xf0   :  { %v212_v37 = vpop.f32.mrb[9].mxu0  ;;  %702 = vmatpush3.bf16.msra.mxu0 %v699_v35  ;;  %730 = vmatpush3.bf16.msra.mxu1 %v699_v35 }
  0xf1   :  { %v703_v38 = vpack.c.bf16 %v613_v36, %v212_v37 }
  0xf3   :  { %v616_v39 = vpop.f32.mrb[10].mxu0  ;;  %704 = vmatprep.subr.bf16.mxu0 %v703_v38  ;;  %723 = vmatprep.subr.bf16.mxu1 %v703_v38 }
  0xf4   :  { %v222_v40 = vpop.f32.mrb[11].mxu0  ;;  %706 = vmatpush3.bf16.msra.mxu0 %v703_v38  ;;  %731 = vmatpush3.bf16.msra.mxu1 %v703_v38 }
  0xf5   :  { %v707_v41 = vpack.c.bf16 %v616_v39, %v222_v40 }
  0xf7   :  { %v619_v42 = vpop.f32.mrb[12].mxu0  ;;  %708 = vmatprep.subr.bf16.mxu0 %v707_v41  ;;  %724 = vmatprep.subr.bf16.mxu1 %v707_v41 }
  0xf8   :  { %v232_v43 = vpop.f32.mrb[13].mxu0  ;;  %710 = vmatpush3.bf16.msra.mxu0 %v707_v41  ;;  %732 = vmatpush3.bf16.msra.mxu1 %v707_v41 }
  0xf9   :  { %v711_v44 = vpack.c.bf16 %v619_v42, %v232_v43 }
  0xfb   :  { %v622_v45 = vpop.f32.mrb[14].mxu0  ;;  %712 = vmatprep.subr.bf16.mxu0 %v711_v44  ;;  %725 = vmatprep.subr.bf16.mxu1 %v711_v44 }
  0xfc   :  { %v242_v46 = vpop.f32.mrb[15].mxu0  ;;  %714 = vmatpush3.bf16.msra.mxu0 %v711_v44  ;;  %733 = vmatpush3.bf16.msra.mxu1 %v711_v44 }
  0xfd   :  { %v715_v47 = vpack.c.bf16 %v622_v45, %v242_v46 }
  0xff   :  { %716 = vmatprep.subr.bf16.mxu0 %v715_v47  ;;  %726 = vmatprep.subr.bf16.mxu1 %v715_v47 }
 0x100   :  { %718 = vmatpush3.bf16.msra.mxu0 %v715_v47  ;;  %734 = vmatpush3.bf16.msra.mxu1 %v715_v47 }
 0x103   :  { %665 = vmatmul.mubr.f32.vlgmr.msra.gmra.mrb[0].mxu1 %v258_v48  ;;  %656 = vmatmul.mubr.f32.vlgmr.msra.gmra.mrb[16].mxu0 %v252_v49 }
 0x104   :  { %667 = vmatprep.mubr.f32.mxu1 %v259_v50  ;;  %658 = vmatprep.mubr.f32.mxu0 %v253_v51 }
 0x107   :  { %668 = vmatmul.mubr.f32.gmra.mrb[2].mxu1 %v260_v52  ;;  %659 = vmatmul.mubr.f32.gmra.mrb[18].mxu0 %v254_v53 }
 0x108   :  { %670 = vmatprep.mubr.f32.mxu1 %v261_v54  ;;  %661 = vmatprep.mubr.f32.mxu0 %v255_v55 }
 0x10b   :  { %671 = vmatmul.mubr.f32.gmra.mrb[4].mxu1 %v262_v56  ;;  %662 = vmatmul.mubr.f32.gmra.mrb[20].mxu0 %v256_v57 }
 0x10c   :  { %673 = vmatprep.mubr.f32.mxu1 %v263_v58 }
 0x10f   :  { %674 = vmatmul.mubr.f32.gmra.mrb[6].mxu1 %v264_v59 }
 0x110   :  { %676 = vmatprep.mubr.f32.mxu1 %v265_v60 }
 0x113   :  { %677 = vmatmul.mubr.f32.gmra.mrb[8].mxu1 %v266_v61 }
 0x1d6   :  { %v666_v63 = vpop.f32.mrb[0].mxu1  ;;  %v657_v0 = vpop.f32.mrb[16].mxu0 }
 0x1d7   :  { %v493_v1 = vadd.f32 %v666_v63, %v538_v62  ;;  %v379_v2 = vpop.f32.mrb[1].mxu1  ;;  %v487_v3 = vadd.f32 %v657_v0, %v538_v62  ;;  %v349_v4 = vpop.f32.mrb[17].mxu0 }
 0x1d8   :  { %v492_v5 = vadd.f32 %v538_v62, %v379_v2  ;;  %v486_v6 = vadd.f32 %v538_v62, %v349_v4 }
 0x1d9   :  { %509 = vst [vmem:[%s939_s4 + $0x38] sm:$0xff] %v493_v1  ;;  %503 = vst [vmem:[%s939_s4 + $0x8] sm:$0xff] %v487_v3 }
 0x1da   :  { %508 = vst [vmem:[%s939_s4 + $0x30] sm:$0xff] %v492_v5  ;;  %v669_v7 = vpop.f32.mrb[2].mxu1  ;;  %502 = vst [vmem:[%s939_s4] sm:$0xff] %v486_v6  ;;  %v660_v8 = vpop.f32.mrb[18].mxu0 }
 0x1db   :  { %v495_v9 = vadd.f32 %v669_v7, %v538_v62  ;;  %v389_v10 = vpop.f32.mrb[3].mxu1  ;;  %v489_v11 = vadd.f32 %v660_v8, %v538_v62  ;;  %v359_v12 = vpop.f32.mrb[19].mxu0 }
 0x1dc   :  { %v494_v13 = vadd.f32 %v538_v62, %v389_v10  ;;  %v488_v14 = vadd.f32 %v538_v62, %v359_v12 }
 0x1dd   :  { %511 = vst [vmem:[%s939_s4 + $0x48] sm:$0xff] %v495_v9  ;;  %505 = vst [vmem:[%s939_s4 + $0x18] sm:$0xff] %v489_v11 }
 0x1de   :  { %510 = vst [vmem:[%s939_s4 + $0x40] sm:$0xff] %v494_v13  ;;  %v672_v15 = vpop.f32.mrb[4].mxu1  ;;  %504 = vst [vmem:[%s939_s4 + $0x10] sm:$0xff] %v488_v14  ;;  %v663_v16 = vpop.f32.mrb[20].mxu0 }
 0x1df   :  { %v497_v17 = vadd.f32 %v672_v15, %v538_v62  ;;  %v399_v18 = vpop.f32.mrb[5].mxu1  ;;  %v491_v19 = vadd.f32 %v663_v16, %v538_v62  ;;  %v369_v20 = vpop.f32.mrb[21].mxu0 }
 0x1e0   :  { %v496_v21 = vadd.f32 %v538_v62, %v399_v18  ;;  %v490_v22 = vadd.f32 %v538_v62, %v369_v20 }
 0x1e1   :  { %513 = vst [vmem:[%s939_s4 + $0x58] sm:$0xff] %v497_v17  ;;  %507 = vst [vmem:[%s939_s4 + $0x28] sm:$0xff] %v491_v19 }
 0x1e2   :  { %512 = vst [vmem:[%s939_s4 + $0x50] sm:$0xff] %v496_v21  ;;  %v675_v23 = vpop.f32.mrb[6].mxu1  ;;  %506 = vst [vmem:[%s939_s4 + $0x20] sm:$0xff] %v490_v22 }
 0x1e3   :  { %v499_v24 = vadd.f32 %v675_v23, %v538_v62  ;;  %v409_v25 = vpop.f32.mrb[7].mxu1 }
 0x1e4   :  { %v498_v26 = vadd.f32 %v538_v62, %v409_v25 }
 0x1e5   :  { %515 = vst [vmem:[%s939_s4 + $0x68] sm:$0xff] %v499_v24 }
 0x1e6   :  { %514 = vst [vmem:[%s939_s4 + $0x60] sm:$0xff] %v498_v26  ;;  %v678_v27 = vpop.f32.mrb[8].mxu1 }
 0x1e7   :  { %v501_v28 = vadd.f32 %v678_v27, %v538_v62  ;;  %v419_v29 = vpop.f32.mrb[9].mxu1 }
 0x1e8   :  { %v500_v30 = vadd.f32 %v538_v62, %v419_v29 }
 0x1e9   :  { %517 = vst [vmem:[%s939_s4 + $0x78] sm:$0xff] %v501_v28 }
 0x1ea   :  { %516 = vst [vmem:[%s939_s4 + $0x70] sm:$0xff] %v500_v30 }

</bundles_post_ra>
